<compile_context>
chip_gen: v5e
topology: v5e:2x2
jax: 0.10.0
libtpu: 0.0.40
codegen_flags: <defaults>
</compile_context>

<pallas_src>
import functools

import jax
import jax.numpy as jnp
from jax.experimental import pallas as pl
from jax.experimental.pallas import tpu as pltpu


HIDDEN = 128
CLIP_BOUND = 10.0
# No-max-subtraction softmax is only valid while exp(CLIP_BOUND) is finite
# (and comfortably so) in f32.
assert CLIP_BOUND < 80.0, "clip bound too large for max-free softmax"


def _round_up(n, m):
    return (n + m - 1) // m * m


def _ppo_kernel(x_ref, w1_ref, b1_ref, w2_ref, b2_ref,
                wav_ref, bav_ref, amask_ref, vmask_ref, out_ref):
    # Cast x to bf16 in-kernel (slack VPU slot) instead of a wrapper pass.
    x = x_ref[...].astype(jnp.bfloat16)                         # [TB, Din]

    # fc1 + relu   (MXU bf16 operands, f32 accumulate; VPU math in f32)
    h1 = jnp.dot(x, w1_ref[...], preferred_element_type=jnp.float32)
    h1 = jnp.maximum(h1 + b1_ref[...], 0.0)                     # f32 [TB, 128]

    # fc2 + relu
    h2 = jnp.dot(h1.astype(jnp.bfloat16), w2_ref[...],
                 preferred_element_type=jnp.float32)
    h2 = jnp.maximum(h2 + b2_ref[...], 0.0)                     # f32 [TB, 128]

    # Fused action+value head: one MXU push, lane-dense [TB, 128] result.
    # Columns 0..A-1 = action logits, column A = state value, rest = 0.
    z = jnp.dot(h2.astype(jnp.bfloat16), wav_ref[...],
                preferred_element_type=jnp.float32)
    z = z + bav_ref[...]                                        # f32 [TB, 128]

    # clamp + softmax over the action lanes.  The clamp bounds the logits so
    # exp() cannot overflow and the usual max-subtraction is unnecessary.
    amask = amask_ref[...]                                      # (1,128) 0/1 f32
    vmask = vmask_ref[...]                                      # (1,128) 0/1 f32
    logits = jnp.clip(z, -CLIP_BOUND, CLIP_BOUND)
    e = jnp.exp(logits) * amask                                 # zero non-action lanes
    denom = jnp.sum(e, axis=-1, keepdims=True)                  # [TB, 1]

    # EUP approximate reciprocal + one Newton-Raphson step (~1e-6 rel error),
    # keeping the exact divide off the VPU critical path.
    r = pl.reciprocal(denom, approx=True)
    r = r * (2.0 - denom * r)

    # Action lanes carry probs; lane A carries the (unclamped) state value;
    # lanes > A stay 0.  Single unmasked 128-lane store.
    out_ref[...] = e * r + vmask * z


def prepare_params(params):
    """Fuse action/value heads, pad to 128 lanes, build lane masks, cast to bf16."""
    w1, b1, w2, b2, wa, ba, wv, bv = params
    H = w1.shape[1]
    A = wa.shape[1]
    assert A + 1 <= H, "fused head assumes action_dim + 1 <= hidden width"

    w_av = jnp.zeros((H, H), jnp.float32)
    w_av = w_av.at[:, :A].set(wa).at[:, A:A + 1].set(wv)
    b_av = jnp.zeros((1, H), jnp.float32)
    b_av = b_av.at[:, :A].set(ba).at[:, A:A + 1].set(bv)

    # Precomputed 0/1 lane masks (replace per-tile iota + where in the kernel).
    amask = jnp.zeros((1, H), jnp.float32).at[:, :A].set(1.0)
    vmask = jnp.zeros((1, H), jnp.float32).at[0, A].set(1.0)

    fused = (w1.astype(jnp.bfloat16), b1,
             w2.astype(jnp.bfloat16), b2,
             w_av.astype(jnp.bfloat16), b_av,
             amask, vmask)
    return fused, A


def _const_spec(arr):
    nd = arr.ndim
    return pl.BlockSpec(arr.shape, lambda i, _nd=nd: (0,) * _nd)


def _pick_tile(B):
    """Batch tile: >=2 grid steps when possible (v7x TC split), low pad waste."""
    # Mirrors the review suggestion: TB = min(512, round_up(ceil(B/2), 8)).
    tb = min(512, _round_up(pl.cdiv(B, 2), 8))
    b_pad = _round_up(B, tb)
    # If padding waste is large (B barely over a multiple of tb), shrink tb.
    for cand in (256, 128, 64, 32, 16, 8):
        if cand >= tb:
            continue
        b_pad_c = _round_up(B, cand)
        if b_pad_c < b_pad:
            tb, b_pad = cand, b_pad_c
        if (b_pad - B) * 8 <= B:       # waste <= 12.5% -> good enough
            break
    return tb, b_pad


@functools.partial(jax.jit, static_argnums=(2,))
def ppo_policy_forward(x, fused_params, action_dim):
    """x: [B, input_dim] f32.  Returns (probs [B, A] f32, value [B, 1] f32)."""
    w1, b1, w2, b2, w_av, b_av, amask, vmask = fused_params
    B, din = x.shape
    H = w1.shape[1]

    TB, B_pad = _pick_tile(B)
    if B_pad != B:
        x = jnp.pad(x, ((0, B_pad - B), (0, 0)))

    out = pl.pallas_call(
        _ppo_kernel,
        out_shape=jax.ShapeDtypeStruct((B_pad, H), jnp.float32),
        grid=(B_pad // TB,),
        in_specs=[
            pl.BlockSpec((TB, din), lambda i: (i, 0)),   # x tile (f32)
            _const_spec(w1), _const_spec(b1),            # weights stay resident
            _const_spec(w2), _const_spec(b2),
            _const_spec(w_av), _const_spec(b_av),
            _const_spec(amask), _const_spec(vmask),
        ],
        out_specs=pl.BlockSpec((TB, H), lambda i: (i, 0)),
        compiler_params=pltpu.CompilerParams(
            dimension_semantics=("parallel",)),           # shard batch on v7x TCs
    )(x, w1, b1, w2, b2, w_av, b_av, amask, vmask)

    # Slicing happens inside the same jit region -> fuses with the writeback.
    probs = out[:B, :action_dim]
    value = out[:B, action_dim:action_dim + 1]
    return probs, value


def init_params(key, input_dim, action_dim, hidden=HIDDEN):
    """Deterministic synthetic parameters (PyTorch-style uniform fan-in init)."""
    ks = jax.random.split(key, 8)

    def lin(kw, kb, fan_in, fan_out):
        bound = 1.0 / jnp.sqrt(fan_in)
        w = jax.random.uniform(kw, (fan_in, fan_out), jnp.float32, -bound, bound)
        b = jax.random.uniform(kb, (1, fan_out), jnp.float32, -bound, bound)
        return w, b

    w1, b1 = lin(ks[0], ks[1], input_dim, hidden)
    w2, b2 = lin(ks[2], ks[3], hidden, hidden)
    wa, ba = lin(ks[4], ks[5], hidden, action_dim)
    wv, bv = lin(ks[6], ks[7], hidden, 1)
    return (w1, b1, w2, b2, wa, ba, wv, bv)


def reference_forward_f32(x, params):
    """Pure-f32 reference matching the PyTorch module."""
    w1, b1, w2, b2, wa, ba, wv, bv = params
    h1 = jnp.maximum(x @ w1 + b1, 0.0)
    h2 = jnp.maximum(h1 @ w2 + b2, 0.0)
    logits = jnp.clip(h2 @ wa + ba, -CLIP_BOUND, CLIP_BOUND)
    probs = jax.nn.softmax(logits, axis=-1)
    value = h2 @ wv + bv
    return probs, value


def reference_forward_bf16(x, fused_params, action_dim):
    """Reference that mirrors the kernel's bf16-operand / f32-accumulate math."""
    w1, b1, w2, b2, w_av, b_av, _, _ = fused_params
    xb = x.astype(jnp.bfloat16)
    h1 = jnp.maximum(
        jnp.dot(xb, w1, preferred_element_type=jnp.float32) + b1, 0.0)
    h2 = jnp.maximum(
        jnp.dot(h1.astype(jnp.bfloat16), w2,
                preferred_element_type=jnp.float32) + b2, 0.0)
    z = jnp.dot(h2.astype(jnp.bfloat16), w_av,
                preferred_element_type=jnp.float32) + b_av
    logits = jnp.clip(z[:, :action_dim], -CLIP_BOUND, CLIP_BOUND)
    probs = jax.nn.softmax(logits, axis=-1)
    value = z[:, action_dim:action_dim + 1]
    return probs, value


if __name__ == "__main__":
    B, INPUT_DIM, ACTION_DIM = 8, 32, 8

    key = jax.random.PRNGKey(0)
    k_x, k_p = jax.random.split(key)
    x = jax.random.normal(k_x, (B, INPUT_DIM), jnp.float32)
    params = init_params(k_p, INPUT_DIM, ACTION_DIM)
    fused_params, A = prepare_params(params)

    probs, value = ppo_policy_forward(x, fused_params, A)
    probs = jax.block_until_ready(probs)
    value = jax.block_until_ready(value)

    assert probs.shape == (B, ACTION_DIM)
    assert value.shape == (B, 1)

    # Tight check against a reference using the same bf16-operand math.
    ref_probs, ref_value = reference_forward_bf16(x, fused_params, A)
    assert jnp.allclose(probs, ref_probs, atol=5e-3, rtol=5e-3)
    assert jnp.allclose(value, ref_value, atol=5e-3, rtol=5e-3)

    # Loose check against the pure-f32 PyTorch-equivalent forward
    # (bf16 matmul operands introduce ~1e-3 relative error by design).
    f32_probs, f32_value = reference_forward_f32(x, params)
    assert jnp.allclose(probs, f32_probs, atol=5e-2, rtol=5e-2)
    assert jnp.allclose(value, f32_value, atol=5e-2, rtol=5e-2)

    # Softmax sanity: NR-refined reciprocal keeps rows summing to 1 at ~1e-6.
    assert jnp.allclose(jnp.sum(probs, axis=-1), 1.0, atol=1e-5)

    print("KERNEL_OK")
</pallas_src>

<mosaic_0001>
module attributes {stable_mosaic.version = 11 : i64} {
  func.func @_ppo_kernel(%arg0: i32, %arg1: memref<8x32xf32, #tpu.memory_space<vmem>>, %arg2: memref<32x128xbf16, #tpu.memory_space<vmem>>, %arg3: memref<1x128xf32, #tpu.memory_space<vmem>>, %arg4: memref<128x128xbf16, #tpu.memory_space<vmem>>, %arg5: memref<1x128xf32, #tpu.memory_space<vmem>>, %arg6: memref<128x128xbf16, #tpu.memory_space<vmem>>, %arg7: memref<1x128xf32, #tpu.memory_space<vmem>>, %arg8: memref<1x128xf32, #tpu.memory_space<vmem>>, %arg9: memref<1x128xf32, #tpu.memory_space<vmem>>, %arg10: memref<8x128xf32, #tpu.memory_space<vmem>>) attributes {dimension_semantics = [#tpu.dimension_semantics<parallel>], iteration_bounds = array<i64: 1>, scalar_prefetch = 0 : i64, scratch_operands = 0 : i64, tpu.core_type = #tpu.core_type<tc>, window_params = [{transform_indices = @transform_0, window_bounds = array<i64: 8, 32>}, {pipeline_mode = #tpu.pipeline_mode<synchronous>, transform_indices = @transform_1, window_bounds = array<i64: 32, 128>}, {pipeline_mode = #tpu.pipeline_mode<synchronous>, transform_indices = @transform_2, window_bounds = array<i64: 1, 128>}, {pipeline_mode = #tpu.pipeline_mode<synchronous>, transform_indices = @transform_3, window_bounds = array<i64: 128, 128>}, {pipeline_mode = #tpu.pipeline_mode<synchronous>, transform_indices = @transform_4, window_bounds = array<i64: 1, 128>}, {pipeline_mode = #tpu.pipeline_mode<synchronous>, transform_indices = @transform_5, window_bounds = array<i64: 128, 128>}, {pipeline_mode = #tpu.pipeline_mode<synchronous>, transform_indices = @transform_6, window_bounds = array<i64: 1, 128>}, {pipeline_mode = #tpu.pipeline_mode<synchronous>, transform_indices = @transform_7, window_bounds = array<i64: 1, 128>}, {pipeline_mode = #tpu.pipeline_mode<synchronous>, transform_indices = @transform_8, window_bounds = array<i64: 1, 128>}, {transform_indices = @transform_9, window_bounds = array<i64: 8, 128>}]} {
    %c0 = arith.constant 0 : index
    %c0_0 = arith.constant 0 : index
    %0 = vector.load %arg1[%c0, %c0_0] : memref<8x32xf32, #tpu.memory_space<vmem>>, vector<8x32xf32>
    %1 = arith.truncf %0 : vector<8x32xf32> to vector<8x32xbf16>
    %c0_1 = arith.constant 0 : index
    %c0_2 = arith.constant 0 : index
    %2 = vector.load %arg2[%c0_1, %c0_2] : memref<32x128xbf16, #tpu.memory_space<vmem>>, vector<32x128xbf16>
    %cst = arith.constant dense<0.000000e+00> : vector<8x128xf32>
    %3 = tpu.matmul %1, %2, %cst {dimension_numbers = #tpu.dot_dimension_numbers<[1], [0], [0], [1], [0, 0, 1, 1], [], []>} : vector<8x32xbf16>, vector<32x128xbf16>, vector<8x128xf32> -> vector<8x128xf32>
    %c0_3 = arith.constant 0 : index
    %c0_4 = arith.constant 0 : index
    %4 = vector.load %arg3[%c0_3, %c0_4] : memref<1x128xf32, #tpu.memory_space<vmem>>, vector<1x128xf32>
    %5 = vector.broadcast %4 : vector<1x128xf32> to vector<8x128xf32>
    %6 = arith.addf %3, %5 : vector<8x128xf32>
    %cst_5 = arith.constant 0.000000e+00 : f32
    %7 = vector.broadcast %cst_5 : f32 to vector<8x128xf32>
    %8 = arith.maximumf %6, %7 : vector<8x128xf32>
    %9 = arith.truncf %8 : vector<8x128xf32> to vector<8x128xbf16>
    %c0_6 = arith.constant 0 : index
    %c0_7 = arith.constant 0 : index
    %10 = vector.load %arg4[%c0_6, %c0_7] : memref<128x128xbf16, #tpu.memory_space<vmem>>, vector<128x128xbf16>
    %cst_8 = arith.constant dense<0.000000e+00> : vector<8x128xf32>
    %11 = tpu.matmul %9, %10, %cst_8 {dimension_numbers = #tpu.dot_dimension_numbers<[1], [0], [0], [1], [0, 0, 1, 1], [], []>} : vector<8x128xbf16>, vector<128x128xbf16>, vector<8x128xf32> -> vector<8x128xf32>
    %c0_9 = arith.constant 0 : index
    %c0_10 = arith.constant 0 : index
    %12 = vector.load %arg5[%c0_9, %c0_10] : memref<1x128xf32, #tpu.memory_space<vmem>>, vector<1x128xf32>
    %13 = vector.broadcast %12 : vector<1x128xf32> to vector<8x128xf32>
    %14 = arith.addf %11, %13 : vector<8x128xf32>
    %cst_11 = arith.constant 0.000000e+00 : f32
    %15 = vector.broadcast %cst_11 : f32 to vector<8x128xf32>
    %16 = arith.maximumf %14, %15 : vector<8x128xf32>
    %17 = arith.truncf %16 : vector<8x128xf32> to vector<8x128xbf16>
    %c0_12 = arith.constant 0 : index
    %c0_13 = arith.constant 0 : index
    %18 = vector.load %arg6[%c0_12, %c0_13] : memref<128x128xbf16, #tpu.memory_space<vmem>>, vector<128x128xbf16>
    %cst_14 = arith.constant dense<0.000000e+00> : vector<8x128xf32>
    %19 = tpu.matmul %17, %18, %cst_14 {dimension_numbers = #tpu.dot_dimension_numbers<[1], [0], [0], [1], [0, 0, 1, 1], [], []>} : vector<8x128xbf16>, vector<128x128xbf16>, vector<8x128xf32> -> vector<8x128xf32>
    %c0_15 = arith.constant 0 : index
    %c0_16 = arith.constant 0 : index
    %20 = vector.load %arg7[%c0_15, %c0_16] : memref<1x128xf32, #tpu.memory_space<vmem>>, vector<1x128xf32>
    %21 = vector.broadcast %20 : vector<1x128xf32> to vector<8x128xf32>
    %22 = arith.addf %19, %21 : vector<8x128xf32>
    %c0_17 = arith.constant 0 : index
    %c0_18 = arith.constant 0 : index
    %23 = vector.load %arg8[%c0_17, %c0_18] : memref<1x128xf32, #tpu.memory_space<vmem>>, vector<1x128xf32>
    %c0_19 = arith.constant 0 : index
    %c0_20 = arith.constant 0 : index
    %24 = vector.load %arg9[%c0_19, %c0_20] : memref<1x128xf32, #tpu.memory_space<vmem>>, vector<1x128xf32>
    %cst_21 = arith.constant -1.000000e+01 : f32
    %cst_22 = arith.constant 1.000000e+01 : f32
    %25 = vector.broadcast %cst_21 : f32 to vector<8x128xf32>
    %26 = arith.maximumf %25, %22 : vector<8x128xf32>
    %27 = vector.broadcast %cst_22 : f32 to vector<8x128xf32>
    %28 = arith.minimumf %27, %26 : vector<8x128xf32>
    %29 = math.exp %28 : vector<8x128xf32>
    %30 = vector.broadcast %23 : vector<1x128xf32> to vector<8x128xf32>
    %31 = arith.mulf %29, %30 : vector<8x128xf32>
    %cst_23 = arith.constant dense<0.000000e+00> : vector<8xf32>
    %32 = vector.multi_reduction <add>, %31, %cst_23 [1] : vector<8x128xf32> to vector<8xf32>
    %33 = vector.shape_cast %32 : vector<8xf32> to vector<8x1xf32>
    %34 = tpu.reciprocal %33 {approx = true} : vector<8x1xf32> -> vector<8x1xf32>
    %35 = arith.mulf %33, %34 : vector<8x1xf32>
    %cst_24 = arith.constant 2.000000e+00 : f32
    %36 = vector.broadcast %cst_24 : f32 to vector<8x1xf32>
    %37 = arith.subf %36, %35 : vector<8x1xf32>
    %38 = arith.mulf %34, %37 : vector<8x1xf32>
    %39 = vector.broadcast %38 : vector<8x1xf32> to vector<8x128xf32>
    %40 = arith.mulf %31, %39 : vector<8x128xf32>
    %41 = vector.broadcast %24 : vector<1x128xf32> to vector<8x128xf32>
    %42 = arith.mulf %41, %22 : vector<8x128xf32>
    %43 = arith.addf %40, %42 : vector<8x128xf32>
    %c0_25 = arith.constant 0 : index
    %c0_26 = arith.constant 0 : index
    %44 = vector.load %arg10[%c0_25, %c0_26] : memref<8x128xf32, #tpu.memory_space<vmem>>, vector<8x128xf32>
    tpu.vector_store %arg10[%c0_25, %c0_26], %43 {strides = array<i32>} : memref<8x128xf32, #tpu.memory_space<vmem>>, vector<8x128xf32>,
    return
  }
  func.func @transform_0(%arg0: i32) -> (i32, i32) {
    %c0_i32 = arith.constant 0 : i32
    %c0_i32_0 = arith.constant 0 : i32
    return %arg0, %c0_i32 : i32, i32
  }
  func.func @transform_1(%arg0: i32) -> (i32, i32) {
    %c0_i32 = arith.constant 0 : i32
    %c0_i32_0 = arith.constant 0 : i32
    %c0_i32_1 = arith.constant 0 : i32
    return %c0_i32, %c0_i32_0 : i32, i32
  }
  func.func @transform_2(%arg0: i32) -> (i32, i32) {
    %c0_i32 = arith.constant 0 : i32
    %c0_i32_0 = arith.constant 0 : i32
    %c0_i32_1 = arith.constant 0 : i32
    return %c0_i32, %c0_i32_0 : i32, i32
  }
  func.func @transform_3(%arg0: i32) -> (i32, i32) {
    %c0_i32 = arith.constant 0 : i32
    %c0_i32_0 = arith.constant 0 : i32
    %c0_i32_1 = arith.constant 0 : i32
    return %c0_i32, %c0_i32_0 : i32, i32
  }
  func.func @transform_4(%arg0: i32) -> (i32, i32) {
    %c0_i32 = arith.constant 0 : i32
    %c0_i32_0 = arith.constant 0 : i32
    %c0_i32_1 = arith.constant 0 : i32
    return %c0_i32, %c0_i32_0 : i32, i32
  }
  func.func @transform_5(%arg0: i32) -> (i32, i32) {
    %c0_i32 = arith.constant 0 : i32
    %c0_i32_0 = arith.constant 0 : i32
    %c0_i32_1 = arith.constant 0 : i32
    return %c0_i32, %c0_i32_0 : i32, i32
  }
  func.func @transform_6(%arg0: i32) -> (i32, i32) {
    %c0_i32 = arith.constant 0 : i32
    %c0_i32_0 = arith.constant 0 : i32
    %c0_i32_1 = arith.constant 0 : i32
    return %c0_i32, %c0_i32_0 : i32, i32
  }
  func.func @transform_7(%arg0: i32) -> (i32, i32) {
    %c0_i32 = arith.constant 0 : i32
    %c0_i32_0 = arith.constant 0 : i32
    %c0_i32_1 = arith.constant 0 : i32
    return %c0_i32, %c0_i32_0 : i32, i32
  }
  func.func @transform_8(%arg0: i32) -> (i32, i32) {
    %c0_i32 = arith.constant 0 : i32
    %c0_i32_0 = arith.constant 0 : i32
    %c0_i32_1 = arith.constant 0 : i32
    return %c0_i32, %c0_i32_0 : i32, i32
  }
  func.func @transform_9(%arg0: i32) -> (i32, i32) {
    %c0_i32 = arith.constant 0 : i32
    %c0_i32_0 = arith.constant 0 : i32
    return %arg0, %c0_i32 : i32, i32
  }
}

</mosaic_0001>

<bundles_post_ra>
// kernel: ppo_policy_forward.1
= control target key start
LH: loop header
LB: loop body
LE: loop exit
PB: predicated region body
PF: predicated region fallthrough
CT: control target
= control target key end

     0   :  { %14 = vsyncpa [#allocation3], 0  ;;  %s624_s0 = inlined_call_operand.hbm [shape: f32[8,32], index: 0, kind: input, shape index: {}]   ;;  %s625_s1 = inlined_call_operand.hbm [shape: bf16[32,128], index: 1, kind: input, shape index: {}]   ;;  %s626_s2 = inlined_call_operand.vmem [shape: f32[1,128], index: 2, kind: input, shape index: {}]   ;;  %s627_s3 = inlined_call_operand.hbm [shape: bf16[128,128], index: 3, kind: input, shape index: {}]   ;;  %s628_s4 = inlined_call_operand.vmem [shape: f32[1,128], index: 4, kind: input, shape index: {}]   ;;  %s629_s5 = inlined_call_operand.hbm [shape: bf16[128,128], index: 5, kind: input, shape index: {}]   ;;  %s630_s6 = inlined_call_operand.vmem [shape: f32[1,128], index: 6, kind: input, shape index: {}]   ;;  %s631_s7 = inlined_call_operand.vmem [shape: f32[1,128], index: 7, kind: input, shape index: {}]   ;;  %s632_s8 = inlined_call_operand.vmem [shape: f32[1,128], index: 8, kind: input, shape index: {}]   ;;  %s633_s9 = inlined_call_operand.vmem [shape: f32[8,128], index: 9, kind: output, shape index: {}]  }
   0x1   :  { %15 = vsyncpa [#allocation5], 0  ;;  %s32_s11 = sshll.u32 %s625_s1, 4  ;;  %s33_s11 = int_to_ptr.hbm [resolvable:$true] %s32_s11 }
   0x2   :  { %16 = vsyncpa [#allocation8], 0  ;;  %s538_s12 = smov [#allocation4]   ;;  %s22_s16 = sshll.u32 %s624_s0, 4  ;;  %s23_s16 = int_to_ptr.hbm [resolvable:$true] %s22_s16 }
   0x3   :  { %s34_s13 = sshll.u32 %s538_s12, 4  ;;  %s539_s17 = smov 64   ;;  %s35_s13 = int_to_ptr.vmem [resolvable:$true] %s34_s13 }
   0x4   :  { %s540_s18 = smov 4   ;;  %s541_s19 = smov [#allocation2]  }
   0x5   :  { %40 = dma.hbm_to_vmem [thread:$0]  %s33_s11, 256, %s35_s13, [#allocation5], %s539_s17, %s539_s17, %s540_s18  }
   0x6   :  { %s24_s20 = sshll.u32 %s541_s19, 4  ;;  %s47_s23 = sshll.u32 %s627_s3, 4  ;;  %s25_s20 = int_to_ptr.vmem [resolvable:$true] %s24_s20  ;;  %s48_s23 = int_to_ptr.hbm [resolvable:$true] %s47_s23 }
   0x7   :  { %27 = dma.hbm_to_vmem [thread:$0]  %s23_s16, 128, %s25_s20, [#allocation3]  }
   0x8   :  { %s62_s25 = sshll.u32 %s629_s5, 4  ;;  %s542_s26 = smov [#allocation6]   ;;  %s63_s25 = int_to_ptr.hbm [resolvable:$true] %s62_s25 }
   0x9   :  { %s49_s27 = sshll.u32 %s542_s26, 4  ;;  %s543_s0 = smov [#allocation7]   ;;  %s50_s27 = int_to_ptr.vmem [resolvable:$true] %s49_s27 }
   0xa   :  { %55 = dma.hbm_to_vmem [thread:$0]  %s48_s23, 1024, %s50_s27, [#allocation5], %s539_s17, %s539_s17, %s540_s18  }
   0xb   :  { %s64_s28 = sshll.u32 %s543_s0, 4  ;;  %s65_s28 = int_to_ptr.vmem [resolvable:$true] %s64_s28 }
   0xc   :  { %70 = dma.hbm_to_vmem [thread:$0]  %s63_s25, 1024, %s65_s28, [#allocation8], %s539_s17, %s539_s17, %s540_s18  }
   0xd   :  { %532 = dma.done.wait [#allocation3], 128  }
   0xe   :  { %533 = vsyncadd [#allocation3], 4294967168 }
   0xf   :  { %534 = dma.done.wait [#allocation5], 1280  }
  0x10   :  { %535 = vsyncadd [#allocation5], 4294966016 }
  0x11   :  { %536 = dma.done.wait [#allocation8], 1024  }
  0x12   :  { %537 = vsyncadd [#allocation8], 4294966272  ;;  %v404_v0 = vld [vmem:[#allocation4 + $0x8] sm:$0xff]  ;;  %v403_v2 = vld [vmem:[#allocation4] sm:$0xff]  ;;  %vm116_vm0 = vcmask 261120  }
  0x13   :  { %v412_v1 = vld [vmem:[#allocation6 + $0x38] sm:$0xff]  ;;  %126 = vmatpush.bf16.msra.mxu0 %v404_v0  ;;  %v94_v3 = vld [vmem:[#allocation2] sm:$0xff]  ;;  %v411_v4 = vld [vmem:[#allocation6 + $0x30] sm:$0xff] }
  0x14   :  { %203 = vmatpush.bf16.msra.mxu1 %v412_v1  ;;  %v95_v5 = vpack.c.bf16 %v94_v3, %v94_v3  ;;  %v410_v6 = vld [vmem:[#allocation6 + $0x28] sm:$0xff]  ;;  %v409_v7 = vld [vmem:[#allocation6 + $0x20] sm:$0xff]  ;;  %v408_v8 = vld [vmem:[#allocation6 + $0x18] sm:$0xff] }
  0x15   :  { %v407_v9 = vld [vmem:[#allocation6 + $0x10] sm:$0xff]  ;;  %v406_v10 = vld [vmem:[#allocation6 + $0x8] sm:$0xff]  ;;  %v405_v11 = vld [vmem:[#allocation6] sm:$0xff] }
  0x16   :  { %v420_v12 = vld [vmem:[#allocation7 + $0x38] sm:$0xff]  ;;  %v419_v13 = vld [vmem:[#allocation7 + $0x30] sm:$0xff]  ;;  %v418_v14 = vld [vmem:[#allocation7 + $0x28] sm:$0xff] }
  0x17   :  { %127 = vmatpush.bf16.msra.mxu0 %v403_v2  ;;  %286 = vmatpush.bf16.msra.mxu2 %v420_v12  ;;  %v417_v15 = vld [vmem:[#allocation7 + $0x20] sm:$0xff]  ;;  %v416_v16 = vld [vmem:[#allocation7 + $0x18] sm:$0xff]  ;;  %v415_v17 = vld [vmem:[#allocation7 + $0x10] sm:$0xff] }
  0x18   :  { %204 = vmatpush.bf16.msra.mxu1 %v411_v4  ;;  %v427_v18 = vld [vmem:[%s626_s2] ss:$0 sm:$0xff]  ;;  %v413_v25 = vld [vmem:[#allocation7] sm:$0xff] }
  0x19   :  { %v414_v24 = vld [vmem:[#allocation7 + $0x8] sm:$0xff] }
  0x1a   :  { %337 = vmatmul.msk.bf16.vlgmr.msra.gmra.mxu0 %vm116_vm0, %v95_v5  ;;  %v428_v26 = vld [vmem:[%s628_s4] ss:$0 sm:$0xff] }
  0x1b   :  { %287 = vmatpush.bf16.msra.mxu2 %v419_v13  ;;  %v429_v32 = vld [vmem:[%s630_s6] ss:$0 sm:$0xff] }
  0x1c   :  { %205 = vmatpush.bf16.msra.mxu1 %v410_v6  ;;  %v431_v38 = vld [vmem:[%s631_s7] ss:$0 sm:$0xff] }
  0x1d   :  { %v430_v44 = vld [vmem:[%s632_s8] ss:$0 sm:$0xff] }
  0x1f   :  { %288 = vmatpush.bf16.msra.mxu2 %v418_v14 }
  0x20   :  { %206 = vmatpush.bf16.msra.mxu1 %v409_v7 }
  0x23   :  { %289 = vmatpush.bf16.msra.mxu2 %v417_v15 }
  0x24   :  { %207 = vmatpush.bf16.msra.mxu1 %v408_v8 }
  0x27   :  { %290 = vmatpush.bf16.msra.mxu2 %v416_v16 }
  0x28   :  { %208 = vmatpush.bf16.msra.mxu1 %v407_v9 }
  0x2b   :  { %291 = vmatpush.bf16.msra.mxu2 %v415_v17 }
  0x2c   :  { %209 = vmatpush.bf16.msra.mxu1 %v406_v10 }
  0x2f   :  { %292 = vmatpush.bf16.msra.mxu2 %v414_v24 }
  0x30   :  { %210 = vmatpush.bf16.msra.mxu1 %v405_v11 }
  0x33   :  { %293 = vmatpush.bf16.msra.mxu2 %v413_v25 }
  0x97   :  { %v129_v19 = vpop.f32.mrf.mxu0 }
  0x98   :  { %v130_v20 = vadd.f32 %v427_v18, %v129_v19 }
  0x9a   :  { %v133_v21 = vmax.f32 %v130_v20, 0.0 }
  0x9c   :  { %v134_v22 = vpack.c.bf16 %v133_v21, %v133_v21 }
  0x9e   :  { %211 = vmatmul.bf16.vlgmr.msra.gmra.mxu1 %v134_v22 }
  0x9f   :  { %v131_v23 = vpop.f32.mrf.mxu0 }
 0x11b   :  { %v212_v27 = vpop.f32.mrf.mxu1 }
 0x11c   :  { %v213_v28 = vadd.f32 %v428_v26, %v212_v27 }
 0x11e   :  { %v216_v29 = vmax.f32 %v213_v28, 0.0 }
 0x120   :  { %v217_v30 = vpack.c.bf16 %v216_v29, %v216_v29 }
 0x122   :  { %294 = vmatmul.bf16.vlgmr.msra.gmra.mxu2 %v217_v30 }
 0x123   :  { %v214_v31 = vpop.f32.mrf.mxu1 }
 0x1a5   :  { %v295_v33 = vpop.f32.mrf.mxu2 }
 0x1a6   :  { %v296_v34 = vadd.f32 %v429_v32, %v295_v33 }
 0x1a8   :  { %v402_v35 = vclamps-f32 %v296_v34, 10.0  ;;  %v319_v47 = vmul.f32 %v430_v44, %v296_v34 }
 0x1aa   :  { %v303_v36 = vmul.f32 1.442695, %v402_v35 }
 0x1ac   :  { %432 = vpow2.f32 %v303_v36 }
 0x1ad   :  { %v297_v37 = vpop.f32.mrf.mxu2 }
 0x1b2   :  { %v433_v39 = vpop.eup %432 }
 0x1b3   :  { %v308_v40 = vmul.f32 %v433_v39, %v431_v38 }
 0x1b5   :  { %309 = vadd.xlane.f32.xlu0 %v308_v40 }
 0x228   :  { %v310_v41 = vpop.xlane.xlu0 %309 }
 0x229   :  { %434 = vrcp.f32 %v310_v41 }
 0x22f   :  { %v435_v42 = vpop.eup %434 }
 0x230   :  { %v312_v43 = vmul.f32 %v435_v42, %v310_v41 }
 0x232   :  { %v313_v45 = vsub.f32 2.0, %v312_v43 }
 0x234   :  { %v314_v46 = vmul.f32 %v435_v42, %v313_v45 }
 0x236   :  { %v315_v48 = vmul.f32 %v314_v46, %v308_v40 }
 0x238   :  { %v320_v49 = vadd.f32 %v319_v47, %v315_v48 }
 0x23a   :  { %321 = vst [vmem:[%s633_s9] sm:$0xff] %v320_v49 }
 0x23b   :  { %326 = vsyncpa [#allocation3], 1 }
 0x23c   :  { %327 = vsyncpa [#allocation5], 1 }
 0x23d   :  { %328 = vsyncpa [#allocation8], 1 }

</bundles_post_ra>
